<compile_context>
chip_gen: v5e
topology: v5e:2x2
jax: 0.10.0
libtpu: 0.0.40
codegen_flags: <defaults>
</compile_context>

<pallas_src>
import functools

import jax
import jax.numpy as jnp
from jax.experimental import pallas as pl
from jax.experimental.pallas import tpu as pltpu

# OGB full_atom_feature_dims (get_atom_feature_dims())
FULL_ATOM_FEATURE_DIMS = [119, 5, 12, 12, 10, 6, 6, 2, 2]

SEG = 128          # lane-segment width of the concatenated table
V_PAD = 2 * SEG    # total rows of the concatenated (zero-padded) table


def _round_up(x, m):
    return (x + m - 1) // m * m


def atom_encoder_kernel(idx_ref, table_ref, out_ref):
    # idx_ref:   [TM, F]          int32, absolute indices into the concat table
    # table_ref: [V_PAD, E_pad]   f32 concatenated embedding table (zero-padded)
    # out_ref:   [TM, E_pad]      f32 summed embeddings
    idx = idx_ref[...]
    tm, num_feat = idx.shape

    col = jax.lax.broadcasted_iota(jnp.int32, (tm, SEG), 1)

    # Segment 0: only feature 0 lives in lanes [0, 128) -> one compare.
    half0 = (col == idx[:, 0:1]).astype(jnp.float32)

    # Segment 1: features 1..F-1 (disjoint vocab ranges) live in lanes
    # [128, 256).  Accumulate in int32 (no bf16 VPU on v5e), cast once.
    acc = (col == (idx[:, 1:2] - SEG)).astype(jnp.int32)
    for f in range(2, num_feat):                   # small static F -> unrolled
        acc = acc + (col == (idx[:, f:f + 1] - SEG)).astype(jnp.int32)
    half1 = acc.astype(jnp.float32)

    multi_hot = jnp.concatenate([half0, half1], axis=1)   # [TM, 2*SEG]

    # Single MXU matmul sums all F embeddings at once (f32 x f32, exact).
    out_ref[...] = jnp.dot(
        multi_hot, table_ref[...], preferred_element_type=jnp.float32
    )


@functools.partial(jax.jit, static_argnames=("emb_dim", "tm"))
def atom_encoder(x, table, offsets, *, emb_dim, tm=512):
    """x: [N, F] int32 raw feature indices; table: [V_PAD, E_pad]; offsets: [F]."""
    n, f = x.shape
    v_pad, e_pad = table.shape

    # Row tile selection: big tiles amortize grid-step overhead and fill the
    # MXU; cap for small graphs and keep >= 2 grid steps where possible so the
    # "parallel" axis can be sharded across v7x's two TensorCores.
    n_min = _round_up(n, 8)
    tm_eff = _round_up(min(tm, n_min), 8)
    if tm_eff >= n_min and n_min >= 16:
        tm_eff = _round_up(n_min // 2, 8)
    n_pad = _round_up(n, tm_eff)

    x_off = x.astype(jnp.int32) + offsets[None, :].astype(jnp.int32)
    if n_pad != n:
        # Padded rows point at guaranteed-zero rows of the padded table
        # (row SEG-1 in segment 0, row 2*SEG-1 in segment 1); they are sliced
        # off below anyway.
        pad = jnp.concatenate(
            [jnp.full((n_pad - n, 1), SEG - 1, dtype=jnp.int32),
             jnp.full((n_pad - n, f - 1), 2 * SEG - 1, dtype=jnp.int32)],
            axis=1,
        )
        x_off = jnp.concatenate([x_off, pad], axis=0)

    out = pl.pallas_call(
        atom_encoder_kernel,
        out_shape=jax.ShapeDtypeStruct((n_pad, e_pad), jnp.float32),
        grid_spec=pltpu.PrefetchScalarGridSpec(
            num_scalar_prefetch=0,
            grid=(n_pad // tm_eff,),
            in_specs=[
                pl.BlockSpec((tm_eff, f), lambda i: (i, 0)),
                # Grid-invariant table (256 x E_pad f32 = 128 KiB at E_pad=128);
                # double-buffering it is negligible here.  For very large E on
                # v7x, consider pipeline_mode=pl.Buffered(1) to single-buffer.
                pl.BlockSpec((v_pad, e_pad), lambda i: (0, 0)),
            ],
            # Lane-dense output block (E_pad is a multiple of 128).
            out_specs=pl.BlockSpec((tm_eff, e_pad), lambda i: (i, 0)),
        ),
        compiler_params=pltpu.CompilerParams(
            dimension_semantics=("parallel",),
        ),
    )(x_off, table)
    return out[:n, :emb_dim]


def build_params(emb_dim, key):
    """Xavier-uniform per-feature tables, packed into two 128-row segments."""
    dims = FULL_ATOM_FEATURE_DIMS
    assert dims[0] < SEG, "feature-0 vocab must fit (with a zero row) in seg 0"
    assert sum(dims[1:]) < SEG, "features 1.. must fit (with a zero row) in seg 1"

    e_pad = _round_up(emb_dim, 128)   # lane-dense output stores

    offsets = [0]
    cur = SEG
    for d in dims[1:]:
        offsets.append(cur)
        cur += d

    table = jnp.zeros((V_PAD, e_pad), jnp.float32)
    tables = []
    for i, d in enumerate(dims):
        k = jax.random.fold_in(key, i)
        bound = (6.0 / (d + emb_dim)) ** 0.5    # xavier_uniform_ (gain=1)
        t = jax.random.uniform(k, (d, emb_dim), jnp.float32, -bound, bound)
        tables.append(t)
        table = table.at[offsets[i]:offsets[i] + d, :emb_dim].set(t)

    return table, jnp.array(offsets, jnp.int32), tables


def reference(x, tables):
    """Pure-JAX reference matching the PyTorch forward."""
    out = 0.0
    for i, t in enumerate(tables):
        out = out + t[x[..., i]]
    return out


def _random_indices(key, n_nodes):
    cols = []
    for i, dim in enumerate(FULL_ATOM_FEATURE_DIMS):
        k = jax.random.fold_in(key, 100 + i)
        cols.append(jax.random.randint(k, (n_nodes, 1), 0, dim, jnp.int32))
    return jnp.concatenate(cols, axis=1)   # [N, F] int32


if __name__ == "__main__":
    key = jax.random.PRNGKey(0)
    emb_dim = 32
    f = len(FULL_ATOM_FEATURE_DIMS)

    table, offsets, tables = build_params(emb_dim, jax.random.fold_in(key, 1))

    # Small case: n=16 (tile gets capped to 8 -> 2 grid steps).
    x_small = _random_indices(jax.random.fold_in(key, 2), 16)
    out_small = jax.block_until_ready(
        atom_encoder(x_small, table, offsets, emb_dim=emb_dim))
    ref_small = reference(x_small, tables)
    assert out_small.shape == (16, emb_dim)
    assert jnp.allclose(out_small, ref_small, atol=1e-5, rtol=1e-5)

    # Medium case: exercises multi-tile grid and row padding.
    x_med = _random_indices(jax.random.fold_in(key, 3), 300)
    out_med = jax.block_until_ready(
        atom_encoder(x_med, table, offsets, emb_dim=emb_dim, tm=256))
    ref_med = reference(x_med, tables)
    assert out_med.shape == (300, emb_dim)
    assert jnp.allclose(out_med, ref_med, atol=1e-5, rtol=1e-5)

    print("KERNEL_OK")
</pallas_src>

<mosaic_0001>
module attributes {stable_mosaic.version = 11 : i64} {
  func.func @atom_encoder_kernel(%arg0: i32, %arg1: memref<8x9xi32, #tpu.memory_space<vmem>>, %arg2: memref<256x128xf32, #tpu.memory_space<vmem>>, %arg3: memref<8x128xf32, #tpu.memory_space<vmem>>) attributes {dimension_semantics = [#tpu.dimension_semantics<parallel>], iteration_bounds = array<i64: 2>, scalar_prefetch = 0 : i64, scratch_operands = 0 : i64, tpu.core_type = #tpu.core_type<tc>, window_params = [{transform_indices = @transform_0, window_bounds = array<i64: 8, 9>}, {pipeline_mode = #tpu.pipeline_mode<synchronous>, transform_indices = @transform_1, window_bounds = array<i64: 256, 128>}, {transform_indices = @transform_2, window_bounds = array<i64: 8, 128>}]} {
    %c0 = arith.constant 0 : index
    %c0_0 = arith.constant 0 : index
    %0 = vector.load %arg1[%c0, %c0_0] : memref<8x9xi32, #tpu.memory_space<vmem>>, vector<8x9xi32>
    %1 = tpu.iota {dimensions = array<i32: 1>} : vector<8x128xi32>
    %2 = vector.extract_strided_slice %0 {offsets = [0, 0], sizes = [8, 1], strides = [1, 1]} : vector<8x9xi32> to vector<8x1xi32>
    %3 = vector.broadcast %2 : vector<8x1xi32> to vector<8x128xi32>
    %4 = arith.cmpi eq, %1, %3 : vector<8x128xi32>
    %5 = arith.extui %4 : vector<8x128xi1> to vector<8x128xi32>
    %6 = arith.sitofp %5 : vector<8x128xi32> to vector<8x128xf32>
    %7 = vector.extract_strided_slice %0 {offsets = [0, 1], sizes = [8, 1], strides = [1, 1]} : vector<8x9xi32> to vector<8x1xi32>
    %c128_i32 = arith.constant 128 : i32
    %8 = vector.broadcast %c128_i32 : i32 to vector<8x1xi32>
    %9 = arith.subi %7, %8 : vector<8x1xi32>
    %10 = vector.broadcast %9 : vector<8x1xi32> to vector<8x128xi32>
    %11 = arith.cmpi eq, %1, %10 : vector<8x128xi32>
    %12 = arith.extui %11 : vector<8x128xi1> to vector<8x128xi32>
    %13 = vector.extract_strided_slice %0 {offsets = [0, 2], sizes = [8, 1], strides = [1, 1]} : vector<8x9xi32> to vector<8x1xi32>
    %c128_i32_1 = arith.constant 128 : i32
    %14 = vector.broadcast %c128_i32_1 : i32 to vector<8x1xi32>
    %15 = arith.subi %13, %14 : vector<8x1xi32>
    %16 = vector.broadcast %15 : vector<8x1xi32> to vector<8x128xi32>
    %17 = arith.cmpi eq, %1, %16 : vector<8x128xi32>
    %18 = arith.extui %17 : vector<8x128xi1> to vector<8x128xi32>
    %19 = arith.addi %12, %18 : vector<8x128xi32>
    %20 = vector.extract_strided_slice %0 {offsets = [0, 3], sizes = [8, 1], strides = [1, 1]} : vector<8x9xi32> to vector<8x1xi32>
    %c128_i32_2 = arith.constant 128 : i32
    %21 = vector.broadcast %c128_i32_2 : i32 to vector<8x1xi32>
    %22 = arith.subi %20, %21 : vector<8x1xi32>
    %23 = vector.broadcast %22 : vector<8x1xi32> to vector<8x128xi32>
    %24 = arith.cmpi eq, %1, %23 : vector<8x128xi32>
    %25 = arith.extui %24 : vector<8x128xi1> to vector<8x128xi32>
    %26 = arith.addi %19, %25 : vector<8x128xi32>
    %27 = vector.extract_strided_slice %0 {offsets = [0, 4], sizes = [8, 1], strides = [1, 1]} : vector<8x9xi32> to vector<8x1xi32>
    %c128_i32_3 = arith.constant 128 : i32
    %28 = vector.broadcast %c128_i32_3 : i32 to vector<8x1xi32>
    %29 = arith.subi %27, %28 : vector<8x1xi32>
    %30 = vector.broadcast %29 : vector<8x1xi32> to vector<8x128xi32>
    %31 = arith.cmpi eq, %1, %30 : vector<8x128xi32>
    %32 = arith.extui %31 : vector<8x128xi1> to vector<8x128xi32>
    %33 = arith.addi %26, %32 : vector<8x128xi32>
    %34 = vector.extract_strided_slice %0 {offsets = [0, 5], sizes = [8, 1], strides = [1, 1]} : vector<8x9xi32> to vector<8x1xi32>
    %c128_i32_4 = arith.constant 128 : i32
    %35 = vector.broadcast %c128_i32_4 : i32 to vector<8x1xi32>
    %36 = arith.subi %34, %35 : vector<8x1xi32>
    %37 = vector.broadcast %36 : vector<8x1xi32> to vector<8x128xi32>
    %38 = arith.cmpi eq, %1, %37 : vector<8x128xi32>
    %39 = arith.extui %38 : vector<8x128xi1> to vector<8x128xi32>
    %40 = arith.addi %33, %39 : vector<8x128xi32>
    %41 = vector.extract_strided_slice %0 {offsets = [0, 6], sizes = [8, 1], strides = [1, 1]} : vector<8x9xi32> to vector<8x1xi32>
    %c128_i32_5 = arith.constant 128 : i32
    %42 = vector.broadcast %c128_i32_5 : i32 to vector<8x1xi32>
    %43 = arith.subi %41, %42 : vector<8x1xi32>
    %44 = vector.broadcast %43 : vector<8x1xi32> to vector<8x128xi32>
    %45 = arith.cmpi eq, %1, %44 : vector<8x128xi32>
    %46 = arith.extui %45 : vector<8x128xi1> to vector<8x128xi32>
    %47 = arith.addi %40, %46 : vector<8x128xi32>
    %48 = vector.extract_strided_slice %0 {offsets = [0, 7], sizes = [8, 1], strides = [1, 1]} : vector<8x9xi32> to vector<8x1xi32>
    %c128_i32_6 = arith.constant 128 : i32
    %49 = vector.broadcast %c128_i32_6 : i32 to vector<8x1xi32>
    %50 = arith.subi %48, %49 : vector<8x1xi32>
    %51 = vector.broadcast %50 : vector<8x1xi32> to vector<8x128xi32>
    %52 = arith.cmpi eq, %1, %51 : vector<8x128xi32>
    %53 = arith.extui %52 : vector<8x128xi1> to vector<8x128xi32>
    %54 = arith.addi %47, %53 : vector<8x128xi32>
    %55 = vector.extract_strided_slice %0 {offsets = [0, 8], sizes = [8, 1], strides = [1, 1]} : vector<8x9xi32> to vector<8x1xi32>
    %c128_i32_7 = arith.constant 128 : i32
    %56 = vector.broadcast %c128_i32_7 : i32 to vector<8x1xi32>
    %57 = arith.subi %55, %56 : vector<8x1xi32>
    %58 = vector.broadcast %57 : vector<8x1xi32> to vector<8x128xi32>
    %59 = arith.cmpi eq, %1, %58 : vector<8x128xi32>
    %60 = arith.extui %59 : vector<8x128xi1> to vector<8x128xi32>
    %61 = arith.addi %54, %60 : vector<8x128xi32>
    %62 = arith.sitofp %61 : vector<8x128xi32> to vector<8x128xf32>
    %63 = tpu.concatenate %6, %62 in 1 : vector<8x128xf32>, vector<8x128xf32> -> vector<8x256xf32>
    %c0_8 = arith.constant 0 : index
    %c0_9 = arith.constant 0 : index
    %64 = vector.load %arg2[%c0_8, %c0_9] : memref<256x128xf32, #tpu.memory_space<vmem>>, vector<256x128xf32>
    %cst = arith.constant dense<0.000000e+00> : vector<8x128xf32>
    %65 = tpu.matmul %63, %64, %cst {dimension_numbers = #tpu.dot_dimension_numbers<[1], [0], [0], [1], [0, 0, 1, 1], [], []>} : vector<8x256xf32>, vector<256x128xf32>, vector<8x128xf32> -> vector<8x128xf32>
    %c0_10 = arith.constant 0 : index
    %c0_11 = arith.constant 0 : index
    %66 = vector.load %arg3[%c0_10, %c0_11] : memref<8x128xf32, #tpu.memory_space<vmem>>, vector<8x128xf32>
    tpu.vector_store %arg3[%c0_10, %c0_11], %65 {strides = array<i32>} : memref<8x128xf32, #tpu.memory_space<vmem>>, vector<8x128xf32>,
    return
  }
  func.func @transform_0(%arg0: i32) -> (i32, i32) {
    %c0_i32 = arith.constant 0 : i32
    %c0_i32_0 = arith.constant 0 : i32
    return %arg0, %c0_i32 : i32, i32
  }
  func.func @transform_1(%arg0: i32) -> (i32, i32) {
    %c0_i32 = arith.constant 0 : i32
    %c0_i32_0 = arith.constant 0 : i32
    %c0_i32_1 = arith.constant 0 : i32
    return %c0_i32, %c0_i32_0 : i32, i32
  }
  func.func @transform_2(%arg0: i32) -> (i32, i32) {
    %c0_i32 = arith.constant 0 : i32
    %c0_i32_0 = arith.constant 0 : i32
    return %arg0, %c0_i32 : i32, i32
  }
}

</mosaic_0001>

<bundles_post_ra>
// kernel: atom_encoder.1
= control target key start
LH: loop header
LB: loop body
LE: loop exit
PB: predicated region body
PF: predicated region fallthrough
CT: control target
= control target key end

     0   :  { %7 = vsyncpa [#allocation3], 0  ;;  %s691_s0 = inlined_call_operand.vmem [shape: s32[16,9], index: 0, kind: input, shape index: {}]   ;;  %s692_s1 = inlined_call_operand.hbm [shape: f32[256,128], index: 1, kind: input, shape index: {}]   ;;  %s693_s2 = inlined_call_operand.hbm [shape: f32[16,128], index: 2, kind: output, shape index: {}]  }
   0x1   :  { %8 = vsyncpa [#allocation4], 0 }
   0x2   :  { %10 = vsyncpa [#allocation4 + $0x1], 0  ;;  %s587_s9 = smov 0   ;;  %s589_s10 = smov 0  }
   0x3   :  { %s591_s11 = smov 0   ;;  %s593_s12 = smov 0  }
   0x4 LB: > { %s608_s13 = sadd.s32 4294967295, %s557_s12   ;;  %s374_s14 = sadd.s32 4294967294, %s557_s12   ;;  %s557_s12 = sphi %s593_s12, %s699_s12   ;;  %s553_s11 = sphi %s591_s11, %s698_s11   ;;  %s549_s10 = sphi %s589_s10, %s697_s10   ;;  %s545_s9 = sphi %s587_s9, %s696_s9  }
   0x5   : > { %s612_s15 = sadd.s32 1, %s557_s12   ;;  %s70_s16 = sadd.s32 1, %s553_s11 }
   0x6   : > { %s67_s17 = ssub.s32 %s557_s12, %s612_s15  ;;  %p80_p0 = scmp.ne.s32.totalorder %s553_s11, %s549_s10 }
   0x7   : > { %p68_p1 = scmp.eq.s32.totalorder %s67_s17, 0  ;;  %p81_p2 = scmp.eq.s32.totalorder %s608_s13, 1 }
   0x8   : > { %p86_p3 = scmp.ne.s32.totalorder %s549_s10, %s545_s9  ;;  %p87_p4 = scmp.eq.s32.totalorder %s374_s14, 1 }
   0x9   : > { %s623_s18 = scalar_select %p68_p1, %s553_s11, %s70_s16  }
   0xa   : > { %p625_p5 = por %p81_p2, %p80_p0  ;;  %p629_p6 = por %p87_p4, %p86_p3 }
   0xb   : > { %p375_p7 = scmp.ge.s32.totalorder %s557_s12, 1  ;;  %p94_p8 = scmp.lt.s32.totalorder %s557_s12, 3 }
   0xc   : > { %p403_p9 = scmp.eq.s32.totalorder %s608_s13, 0  ;;  %s105_s23 = sshll.u32 %s692_s1, 4  ;;  %s106_s23 = int_to_ptr.hbm [resolvable:$true] %s105_s23 }
   0xd   : > { %p95_p10 = pnand %p375_p7, %p94_p8  ;;  %s559_s24 = smov [#allocation2]  }
   0xe   : > { %s107_s25 = sshll.u32 %s559_s24, 4  ;;  %s560_s26 = smov 128   ;;  %s108_s25 = int_to_ptr.vmem [resolvable:$true] %s107_s25 }
   0xf   : > { %p395_p11 = pneg %p95_p10  ;;  %s561_s27 = smov 8  }
  0x10   : > { %130 = sbr.rel (%p95_p10) target bundleno = 304 (0x130), region = 28 }
  0x11   : > { %p396_p12 = pnand %p403_p9, %p395_p11 }
  0x13   : > { %398 = dma.hbm_to_vmem [thread:$0]  (!%p396_p12), %s106_s23, 4096, %s108_s25, [#allocation3], %s560_s26, %s560_s26, %s561_s27  }
  0x15   : > { %536 = dma.done.wait (%p403_p9), [#allocation3], 4096  }
  0x16   : > { %538 = vsyncadd (%p403_p9), [#allocation3], 4294963200  ;;  %p152_p13 = scmp.lt.s32.totalorder %s608_s13, 1  ;;  %v562_v0 = vmov 1   ;;  %v563_v1 = vmov 3   ;;  %v564_v2 = vmov 5   ;;  %v157_v44 = vlaneseq }
  0x17   : > { %451 = vset.pattern.permute.xlu0 %v562_v0  ;;  %453 = vset.pattern.permute.xlu1 %v563_v1  ;;  %v229_v4 = vld [vmem:[#allocation2 + $0x78] sm:$0xff]  ;;  %v228_v7 = vld [vmem:[#allocation2 + $0x70] sm:$0xff]  ;;  %v565_v9 = vmov 2   ;;  %v566_v10 = vmov 4   ;;  %v567_v11 = vmov 6   ;;  %v568_v12 = vmov 7  }
  0x18   : > { %s153_s28 = scalar_select %p152_p13, %s608_s13, 1  ;;  %455 = vset.pattern.permute.xlu2 %v564_v2  ;;  %v245_v5 = vld [vmem:[#allocation2 + $0xf8] sm:$0xff]  ;;  %246 = vmatpush.msra.mxu0 %v229_v4  ;;  %v244_v8 = vld [vmem:[#allocation2 + $0xf0] sm:$0xff]  ;;  %v569_v13 = vmov 0   ;;  %v570_v14 = vmov 8   ;;  %v227_v15 = vld [vmem:[#allocation2 + $0x68] sm:$0xff] }
  0x19   : > { %266 = vmatpush.msra.mxu1 %v245_v5  ;;  %v243_v16 = vld [vmem:[#allocation2 + $0xe8] sm:$0xff]  ;;  %v226_v17 = vld [vmem:[#allocation2 + $0x60] sm:$0xff]  ;;  %v225_v19 = vld [vmem:[#allocation2 + $0x58] sm:$0xff]  ;;  %v158_v47 = vand.u32 127, %v157_v44  ;;  %v571_v2 = vmov 1.0   ;;  %s149_s5 = sand.u32 1, %s549_s10  }
  0x1a   : > { %s381_s29 = sshll.u32 %s153_s28, 3  ;;  %247 = vmatpush.msra.mxu0 %v228_v7  ;;  %v242_v18 = vld [vmem:[#allocation2 + $0xe0] sm:$0xff]  ;;  %v241_v20 = vld [vmem:[#allocation2 + $0xd8] sm:$0xff]  ;;  %v224_v21 = vld [vmem:[#allocation2 + $0x50] sm:$0xff]  ;;  %s380_s6 = sshll.u32 %s149_s5, 3 }
  0x1b   : > { %s155_s4 = scalar_lea.vmem %s691_s0, %s381_s29  ;;  %267 = vmatpush.msra.mxu1 %v244_v8  ;;  %v240_v22 = vld [vmem:[#allocation2 + $0xd0] sm:$0xff]  ;;  %v223_v23 = vld [vmem:[#allocation2 + $0x48] sm:$0xff]  ;;  %v222_v25 = vld [vmem:[#allocation2 + $0x40] sm:$0xff]  ;;  %s386_s7 = sshll.u32 %s608_s13, 3 }
  0x1c   : > { %v156_v3 = vld [vmem:[%s155_s4] sm:$0xff]  ;;  %248 = vmatpush.msra.mxu0 %v227_v15  ;;  %v239_v24 = vld [vmem:[#allocation2 + $0xc8] sm:$0xff]  ;;  %v221_v27 = vld [vmem:[#allocation2 + $0x38] sm:$0xff]  ;;  %s298_s16 = scalar_lea.hbm %s693_s2, %s386_s7  ;;  %s151_s17 = scalar_lea.vmem [#allocation5], %s380_s6 }
  0x1d   : > { %v383_v6 = vadd.s32 4294967168, %v156_v3  ;;  %268 = vmatpush.msra.mxu1 %v243_v16  ;;  %v238_v26 = vld [vmem:[#allocation2 + $0xc0] sm:$0xff]  ;;  %v237_v28 = vld [vmem:[#allocation2 + $0xb8] sm:$0xff]  ;;  %v220_v29 = vld [vmem:[#allocation2 + $0x30] sm:$0xff]  ;;  %s300_s21 = sshll.u32 %s151_s17, 4  ;;  %s302_s22 = sshll.u32 %s298_s16, 4  ;;  %s301_s21 = int_to_ptr.vmem [resolvable:$true] %s300_s21  ;;  %s303_s22 = int_to_ptr.hbm [resolvable:$true] %s302_s22 }
  0x1e   : > { %249 = vmatpush.msra.mxu0 %v226_v17  ;;  %v236_v30 = vld [vmem:[#allocation2 + $0xb0] sm:$0xff]  ;;  %v219_v31 = vld [vmem:[#allocation2 + $0x28] sm:$0xff]  ;;  %v218_v33 = vld [vmem:[#allocation2 + $0x20] sm:$0xff]  ;;  %s288_s23 = scalar_lea.sflag [#allocation4], %s149_s5  ;;  %s505_s24 = sshra.s32 %s303_s22, 4  ;;  %s506_s24 = int_to_ptr.hbm [resolvable:$true] %s505_s24 }
  0x1f   : > { %167 = vperm.xlu0 %451, %v383_v6   ;;  %178 = vperm.xlu1 %453, %v383_v6   ;;  %v235_v32 = vld [vmem:[#allocation2 + $0xa8] sm:$0xff]  ;;  %v234_v34 = vld [vmem:[#allocation2 + $0xa0] sm:$0xff]  ;;  %v217_v35 = vld [vmem:[#allocation2 + $0x18] sm:$0xff]  ;;  %s507_s25 = scalar_lea.hbm %s506_s24, 8  ;;  %s511_s27 = scalar_lea.hbm %s693_s2, 16 }
  0x20   : > { %190 = vperm.xlu2 %455, %v383_v6   ;;  %269 = vmatpush.msra.mxu1 %v242_v18  ;;  %v233_v36 = vld [vmem:[#allocation2 + $0x98] sm:$0xff]  ;;  %v216_v37 = vld [vmem:[#allocation2 + $0x10] sm:$0xff]  ;;  %v215_v39 = vld [vmem:[#allocation2 + $0x8] sm:$0xff]  ;;  %p508_p0 = scmp.ne.s32.totalorder %s506_s24, %s507_s25  ;;  %p512_p3 = scmp.lt.s32.totalorder %s506_s24, %s693_s2 }
  0x21   : > { %250 = vmatpush.msra.mxu0 %v225_v19  ;;  %v232_v38 = vld [vmem:[#allocation2 + $0x90] sm:$0xff]  ;;  %v231_v40 = vld [vmem:[#allocation2 + $0x88] sm:$0xff]  ;;  %v214_v41 = vld [vmem:[#allocation2] sm:$0xff]  ;;  %p513_p4 = scmp.lt.s32.totalorder %s511_s27, %s507_s25 }
  0x22   : > { %270 = vmatpush.msra.mxu1 %v241_v20  ;;  %v230_v42 = vld [vmem:[#allocation2 + $0x80] sm:$0xff]  ;;  %p509_p1 = pnand %p508_p0, %p625_p5 }
  0x23   : > { %251 = vmatpush.msra.mxu0 %v224_v21  ;;  %p514_p7 = por %p513_p4, %p512_p3 }
  0x24   : > { %271 = vmatpush.msra.mxu1 %v240_v22  ;;  %p510_p2 = pneg %p509_p1 }
  0x25   : > { %252 = vmatpush.msra.mxu0 %v223_v23 }
  0x26   : > { %272 = vmatpush.msra.mxu1 %v239_v24  ;;  %p515_p8 = pnand %p514_p7, %p510_p2 }
  0x27   : > { %452 = vset.pattern.permute.xlu0 %v565_v9  ;;  %454 = vset.pattern.permute.xlu1 %v566_v10 }
  0x28   : > { %172 = vperm.xlu0 %452, %v383_v6   ;;  %184 = vperm.xlu1 %454, %v383_v6  }
  0x29   : > { %456 = vset.pattern.permute.xlu2 %v567_v11  ;;  %253 = vmatpush.msra.mxu0 %v222_v25 }
  0x2a   : > { %196 = vperm.xlu2 %456, %v383_v6   ;;  %273 = vmatpush.msra.mxu1 %v238_v26 }
  0x2b   : > { %254 = vmatpush.msra.mxu0 %v221_v27 }
  0x2c   : > { %274 = vmatpush.msra.mxu1 %v237_v28 }
  0x2d   : > { %255 = vmatpush.msra.mxu0 %v220_v29 }
  0x2e   : > { %275 = vmatpush.msra.mxu1 %v236_v30 }
  0x2f   : > { %256 = vmatpush.msra.mxu0 %v219_v31 }
  0x30   : > { %457 = vset.pattern.permute.xlu1 %v568_v12  ;;  %459 = vset.pattern.permute.xlu0 %v569_v13 }
  0x31   : > { %202 = vperm.xlu1 %457, %v383_v6   ;;  %160 = vperm.xlu0 %459, %v156_v3  }
  0x32   : > { %458 = vset.pattern.permute.xlu2 %v570_v14  ;;  %276 = vmatpush.msra.mxu1 %v235_v32 }
  0x33   : > { %208 = vperm.xlu2 %458, %v383_v6   ;;  %257 = vmatpush.msra.mxu0 %v218_v33 }
  0x34   : > { %277 = vmatpush.msra.mxu1 %v234_v34 }
  0x35   : > { %258 = vmatpush.msra.mxu0 %v217_v35 }
  0x36   : > { %278 = vmatpush.msra.mxu1 %v233_v36 }
  0x37   : > { %259 = vmatpush.msra.mxu0 %v216_v37 }
  0x38   : > { %279 = vmatpush.msra.mxu1 %v232_v38 }
  0x39   : > { %460 = vset.pattern.permute.xlu0 %v570_v14  ;;  %260 = vmatpush.msra.mxu0 %v215_v39 }
  0x3a   : > { %280 = vmatpush.msra.mxu1 %v231_v40 }
  0x3b   : > { %261 = vmatpush.msra.mxu0 %v214_v41 }
  0x3c   : > { %281 = vmatpush.msra.mxu1 %v230_v42 }
  0x7a   : > { %v191_v43 = vpop.permute.xlu2 %190 }
  0x7b   : > { %vm192_vm4 = vcmp.eq.s32.totalorder %v158_v47, %v191_v43 }
  0x7c   : > { %v193_v59 = vsel %vm192_vm4, 1, %v569_v13 }
  0x84   : > { %v197_v48 = vpop.permute.xlu2 %196 }
  0x85   : > { %vm198_vm5 = vcmp.eq.s32.totalorder %v158_v47, %v197_v48 }
  0x86   : > { %v199_v63 = vsel %vm198_vm5, 1, %v569_v13 }
  0x8d   : > { %v209_v57 = vpop.permute.xlu2 %208 }
  0x8e   : > { %vm210_vm6 = vcmp.eq.s32.totalorder %v158_v47, %v209_v57 }
  0x8f   : > { %v211_v3 = vsel %vm210_vm6, 1, %v569_v13 }
  0x91   : > { %v168_v45 = vpop.permute.xlu0 %167  ;;  %v179_v46 = vpop.permute.xlu1 %178 }
  0x92   : > { %vm169_vm0 = vcmp.eq.s32.totalorder %v158_v47, %v168_v45  ;;  %vm180_vm1 = vcmp.eq.s32.totalorder %v158_v47, %v179_v46 }
  0x93   : > { %v170_v51 = vsel %vm169_vm0, 1, %v569_v13  ;;  %v181_v54 = vsel %vm180_vm1, 1, %v569_v13 }
  0x9a   : > { %v173_v49 = vpop.permute.xlu0 %172  ;;  %v185_v50 = vpop.permute.xlu1 %184 }
  0x9b   : > { %vm174_vm2 = vcmp.eq.s32.totalorder %v158_v47, %v173_v49  ;;  %vm186_vm3 = vcmp.eq.s32.totalorder %v158_v47, %v185_v50 }
  0x9c   : > { %v175_v52 = vsel %vm174_vm2, 1, %v569_v13  ;;  %v187_v56 = vsel %vm186_vm3, 1, %v569_v13 }
  0x9d   : > { %v176_v53 = vadd.s32 %v175_v52, %v170_v51 }
  0x9f   : > { %v182_v55 = vadd.s32 %v181_v54, %v176_v53 }
  0xa1   : > { %v188_v58 = vadd.s32 %v187_v56, %v182_v55 }
  0xa3   : > { %v194_v60 = vadd.s32 %v193_v59, %v188_v58  ;;  %v203_v61 = vpop.permute.xlu1 %202  ;;  %v161_v62 = vpop.permute.xlu0 %160 }
  0xa4   : > { %vm204_vm7 = vcmp.eq.s32.totalorder %v158_v47, %v203_v61  ;;  %vm162_vm8 = vcmp.eq.s32.totalorder %v158_v47, %v161_v62 }
  0xa5   : > { %v200_v0 = vadd.s32 %v199_v63, %v194_v60  ;;  %v205_v1 = vsel %vm204_vm7, 1, %v569_v13  ;;  %384 = vmatmul.msk.f32.vlgmr.msra.gmra.mxu0 %vm162_vm8, %v571_v2 }
  0xa7   : > { %v206_v4 = vadd.s32 %v205_v1, %v200_v0 }
  0xa9   : > { %v212_v5 = vadd.s32 %v211_v3, %v206_v4 }
  0xab   : > { %v213_v6 = vcvt.s32.f32 %v212_v5 }
  0xad   : > { %282 = vmatmul.f32.vlgmr.msra.gmra.mxu1 %v213_v6 }
 0x122   : > { %v263_v7 = vpop.f32.mrf.mxu0 }
 0x12a   : > { %v283_v8 = vpop.f32.mrf.mxu1 }
 0x12b   : > { %v284_v9 = vadd.f32 %v283_v8, %v263_v7 }
 0x12d   : > { %286 = vst [vmem:[%s151_s17] sm:$0xff] %v284_v9 }
 0x12e   : > { %518 = shalt.err (!%p515_p8)
}
 0x12f   : > { %393 = dma.vmem_to_hbm [thread:$0]  (%p625_p5), %s301_s21, 128, %s303_s22, %s288_s23  }
 0x130 PF: > { %p405_p9 = scmp.ge.s32.totalorder %s557_s12, 2  ;;  %s314_s30 = sand.u32 1, %s545_s9  }
 0x131   : > { %s315_s3 = scalar_lea.sflag [#allocation4], %s314_s30 }
 0x132   : > { %p400_p10 = pnand %p405_p9, %p629_p6 }
 0x134   : > { %p401_p11 = pneg %p400_p10 }
 0x136   : > { %540 = dma.done.wait (%p401_p11), %s315_s3, 128  }
 0x137   : > { %542 = vsyncadd (%p401_p11), %s315_s3, 4294967168  ;;  %p13_p12 = scmp.ge.s32.totalorder %s612_s15, 4   ;;  %s696_s9 = smov %s549_s10 }
 0x138   : > { %s697_s10 = smov %s553_s11  ;;  %s698_s11 = smov %s623_s18 }
 0x139   : > { %s699_s12 = smov %s612_s15  ;;  %15 = sbr.rel (!%p13_p12) target bundleno = 4 (0x4), region = 68 }
 0x13e   :  { %321 = vsyncpa [#allocation3], 1 }
 0x13f   :  { %323 = vsyncpa [#allocation3 + $0x1], 1 }
 0x140   :  { %324 = vsyncpa [#allocation4], 1 }
 0x141   :  { %326 = vsyncpa [#allocation4 + $0x1], 1 }

</bundles_post_ra>
